<compile_context>
chip_gen: v7x
topology: tpu7x:2x2x1
jax: 0.10.0
libtpu: 0.0.40
codegen_flags: <defaults>
</compile_context>

<pallas_src>
import functools

import jax
import jax.numpy as jnp
from jax.experimental import pallas as pl
from jax.experimental.pallas import tpu as pltpu

OUT_LANES = 128  # merged lane-dense output width (pred columns + error column)
ALIGN = 16       # bf16-friendly batch-tile alignment (16 sublanes per packed vreg)


# ----------------------------- Pallas kernel --------------------------------
def metacritic_kernel(s_ref, a_ref,                  # [TB, state_dim], [TB, action_dim]  (bf16)
                      fw1s_ref, fw1a_ref, fb1_ref,   # forward-model layer 1 (split, bf16 / f32 bias)
                      fw2p_ref, fb2p_ref,            # forward-model layer 2, padded to 128 cols
                      w1p_ref, b1_ref,               # metacritic Linear(state_dim->mc_h0), 128 pad rows
                      w2_ref, b2_ref,                # metacritic Linear(mc_h0->mc_h1)
                      w3p_ref, b3p_ref,              # metacritic Linear(mc_h1->1) placed at col state_dim
                      out_ref):                      # [TB, 128] bf16 merged output
    # forward_model layer 1: split matmul == concat([s, a]) @ fw1, no HBM concat.
    # Written as accumulation so v7x can use MRB in-place accumulate.
    h = jnp.dot(s_ref[...], fw1s_ref[...], preferred_element_type=jnp.float32)
    h += jnp.dot(a_ref[...], fw1a_ref[...], preferred_element_type=jnp.float32)
    h = jnp.maximum(h + fb1_ref[...], 0.0)                       # bias+ReLU in f32

    # forward_model layer 2 -> predicted_state, padded to 128 lanes
    # (columns >= state_dim of fw2p/fb2p are zero, so those output columns are 0).
    pred_pad = (jnp.dot(h.astype(fw2p_ref.dtype), fw2p_ref[...],
                        preferred_element_type=jnp.float32) + fb2p_ref[...])

    # metacritic MLP: Linear -> ReLU -> Linear -> ReLU -> Linear(->1)
    # w1p has zero rows for the padded input columns, so pred_pad @ w1p == pred @ w1.
    h1 = jnp.maximum(
        jnp.dot(pred_pad.astype(w1p_ref.dtype), w1p_ref[...],
                preferred_element_type=jnp.float32) + b1_ref[...], 0.0)
    h2 = jnp.maximum(
        jnp.dot(h1.astype(w2_ref.dtype), w2_ref[...],
                preferred_element_type=jnp.float32) + b2_ref[...], 0.0)
    # error head lives in column `state_dim` of a 128-lane slab (zeros elsewhere).
    err_slab = (jnp.dot(h2.astype(w3p_ref.dtype), w3p_ref[...],
                        preferred_element_type=jnp.float32) + b3p_ref[...])

    # single full-width unmasked (TB, 128) store:
    #   cols [0:state_dim] = predicted_state, col [state_dim] = error_estimate.
    out_ref[...] = (pred_pad + err_slab).astype(out_ref.dtype)


# ------------------------------ wrapper --------------------------------------
def _round_up(x, m):
    return ((x + m - 1) // m) * m


@functools.partial(jax.jit, static_argnames=("tb",))
def metacritic_forward(state, action, kparams, *, tb=4096):
    """Returns (predicted_state [B, state_dim] f32, error_estimate [B, 1] f32)."""
    B, state_dim = state.shape
    action_dim = action.shape[1]

    # Batch tiling: large tile to amortize grid-step overhead, but keep >=2 tiles
    # when the batch allows so the "parallel" axis shards across both v7x TCs.
    b_aligned = _round_up(B, ALIGN)
    TB = min(_round_up(tb, ALIGN), b_aligned)
    if b_aligned >= 2 * ALIGN and TB >= b_aligned:
        TB = _round_up(b_aligned // 2, ALIGN)
    Bp = _round_up(max(B, 1), TB)
    n_tiles = Bp // TB

    # bf16 streaming of the batch tiles (halves HBM traffic for the dominant cost).
    s = state.astype(jnp.bfloat16)
    a = action.astype(jnp.bfloat16)
    if Bp != B:
        s = jnp.pad(s, ((0, Bp - B), (0, 0)))
        a = jnp.pad(a, ((0, Bp - B), (0, 0)))

    tiled = lambda feat: pl.BlockSpec((TB, feat), lambda i: (i, 0))
    resident = lambda arr: pl.BlockSpec(arr.shape, lambda i: (0, 0))

    weights = (kparams["fw1_s"], kparams["fw1_a"], kparams["fb1"],
               kparams["fw2p"], kparams["fb2p"],
               kparams["w1p"], kparams["b1"],
               kparams["w2"], kparams["b2"],
               kparams["w3p"], kparams["b3p"])

    in_specs = [tiled(state_dim), tiled(action_dim)] + [resident(w) for w in weights]
    out_specs = tiled(OUT_LANES)
    out_shape = jax.ShapeDtypeStruct((Bp, OUT_LANES), jnp.bfloat16)

    fm_hidden = kparams["fw1_s"].shape[1]
    mc_h0 = kparams["w1p"].shape[1]
    mc_h1 = kparams["w2"].shape[1]
    flops_per_row = 2 * (state_dim * fm_hidden + action_dim * fm_hidden
                         + fm_hidden * OUT_LANES + OUT_LANES * mc_h0
                         + mc_h0 * mc_h1 + mc_h1 * OUT_LANES)
    weight_bytes = sum(int(w.size) * int(w.dtype.itemsize) for w in weights)
    io_bytes = 2 * Bp * (state_dim + action_dim + OUT_LANES)   # bf16 streams
    cost = pl.CostEstimate(flops=flops_per_row * Bp, transcendentals=0,
                           bytes_accessed=io_bytes + weight_bytes)

    out = pl.pallas_call(
        metacritic_kernel,
        grid=(n_tiles,),
        in_specs=in_specs,
        out_specs=out_specs,
        out_shape=out_shape,
        compiler_params=pltpu.CompilerParams(
            dimension_semantics=("parallel",),        # batch tiles are independent
            vmem_limit_bytes=40 * 1024 * 1024),       # headroom for TB=4096 on all gens
        cost_estimate=cost,
    )(s, a, *weights)

    pred = out[:B, :state_dim].astype(jnp.float32)
    err = out[:B, state_dim:state_dim + 1].astype(jnp.float32)
    return pred, err


# --------------------------- deterministic init -------------------------------
def orthogonal_init(key, in_dim, out_dim, gain):
    """Deterministic orthogonal init (nn.init.orthogonal_ semantics), [in, out] layout."""
    a = jax.random.normal(key, (max(in_dim, out_dim), min(in_dim, out_dim)),
                          dtype=jnp.float32)
    q, r = jnp.linalg.qr(a)
    q = q * jnp.sign(jnp.diagonal(r))[None, :]
    w = q[:in_dim, :out_dim] if in_dim >= out_dim else q[:out_dim, :in_dim].T
    return gain * w


def make_base_params(key, state_dim, action_dim, fm_hidden, mc_h):
    """Unpadded f32 weights (reference / source of truth)."""
    gain = float(jnp.sqrt(2.0))
    ks = jax.random.split(key, 5)
    # synthetic forward model: fw1 built over concat([state, action]) then split,
    # so the split matmul in the kernel matches concat @ fw1 (same summation order).
    fw1 = orthogonal_init(ks[0], state_dim + action_dim, fm_hidden, gain)
    return {
        "fw1_s": fw1[:state_dim],
        "fw1_a": fw1[state_dim:],
        "fb1": jnp.zeros((1, fm_hidden), jnp.float32),
        "fw2": orthogonal_init(ks[1], fm_hidden, state_dim, gain),
        "fb2": jnp.zeros((1, state_dim), jnp.float32),
        "w1": orthogonal_init(ks[2], state_dim, mc_h[0], gain),
        "b1": jnp.zeros((1, mc_h[0]), jnp.float32),
        "w2": orthogonal_init(ks[3], mc_h[0], mc_h[1], gain),
        "b2": jnp.zeros((1, mc_h[1]), jnp.float32),
        "w3": orthogonal_init(ks[4], mc_h[1], 1, gain),
        "b3": jnp.zeros((1, 1), jnp.float32),
    }


def pack_kernel_params(base, state_dim):
    """Pad / place weights for the merged 128-lane output and cast matmul weights to bf16."""
    pad = OUT_LANES - state_dim
    fw2p = jnp.pad(base["fw2"], ((0, 0), (0, pad)))                # zero output cols
    fb2p = jnp.pad(base["fb2"], ((0, 0), (0, pad)))
    w1p = jnp.pad(base["w1"], ((0, pad), (0, 0)))                  # zero input rows
    # error head placed at column `state_dim` of the merged output slab
    w3p = jnp.pad(base["w3"], ((0, 0), (state_dim, OUT_LANES - state_dim - 1)))
    b3p = jnp.pad(base["b3"], ((0, 0), (state_dim, OUT_LANES - state_dim - 1)))
    bf = lambda x: x.astype(jnp.bfloat16)
    return {
        "fw1_s": bf(base["fw1_s"]), "fw1_a": bf(base["fw1_a"]), "fb1": base["fb1"],
        "fw2p": bf(fw2p), "fb2p": fb2p,
        "w1p": bf(w1p), "b1": base["b1"],
        "w2": bf(base["w2"]), "b2": base["b2"],
        "w3p": bf(w3p), "b3p": b3p,
    }


# ------------------------------ reference ------------------------------------
def reference_forward(state, action, base):
    """Mirrors the kernel's bf16-weight / f32-accumulate pipeline in plain JAX."""
    bf = jnp.bfloat16
    s = state.astype(bf)
    a = action.astype(bf)
    h = (jnp.dot(s, base["fw1_s"].astype(bf), preferred_element_type=jnp.float32)
         + jnp.dot(a, base["fw1_a"].astype(bf), preferred_element_type=jnp.float32))
    h = jnp.maximum(h + base["fb1"], 0.0)
    pred = jnp.dot(h.astype(bf), base["fw2"].astype(bf),
                   preferred_element_type=jnp.float32) + base["fb2"]
    h1 = jnp.maximum(jnp.dot(pred.astype(bf), base["w1"].astype(bf),
                             preferred_element_type=jnp.float32) + base["b1"], 0.0)
    h2 = jnp.maximum(jnp.dot(h1.astype(bf), base["w2"].astype(bf),
                             preferred_element_type=jnp.float32) + base["b2"], 0.0)
    err = jnp.dot(h2.astype(bf), base["w3"].astype(bf),
                  preferred_element_type=jnp.float32) + base["b3"]
    return pred, err


# -------------------------------- main ----------------------------------------
if __name__ == "__main__":
    key = jax.random.PRNGKey(0)
    k_param, k_state, k_action = jax.random.split(key, 3)

    batch = 8
    state_dim = 32
    action_dim = 8
    fm_hidden = 64
    mc_h = (64, 32)            # config.mc_h = "64,32"

    base = make_base_params(k_param, state_dim, action_dim, fm_hidden, mc_h)
    kparams = pack_kernel_params(base, state_dim)

    state = jax.random.normal(k_state, (batch, state_dim), dtype=jnp.float32)
    action = jax.random.normal(k_action, (batch, action_dim), dtype=jnp.float32)

    pred, err = metacritic_forward(state, action, kparams)
    pred = jax.block_until_ready(pred)
    err = jax.block_until_ready(err)

    pred_ref, err_ref = reference_forward(state, action, base)
    assert pred.shape == (batch, state_dim)
    assert err.shape == (batch, 1)
    assert jnp.allclose(pred, pred_ref, atol=5e-2, rtol=5e-2)
    assert jnp.allclose(err, err_ref, atol=5e-2, rtol=5e-2)

    # Multi-tile path: exercises batch padding and a >=2-tile "parallel" grid.
    k_s2, k_a2 = jax.random.split(k_state)
    state2 = jax.random.normal(k_s2, (40, state_dim), dtype=jnp.float32)
    action2 = jax.random.normal(k_a2, (40, action_dim), dtype=jnp.float32)
    pred2, err2 = metacritic_forward(state2, action2, kparams)
    pred2 = jax.block_until_ready(pred2)
    err2 = jax.block_until_ready(err2)
    pred2_ref, err2_ref = reference_forward(state2, action2, base)
    assert pred2.shape == (40, state_dim) and err2.shape == (40, 1)
    assert jnp.allclose(pred2, pred2_ref, atol=5e-2, rtol=5e-2)
    assert jnp.allclose(err2, err2_ref, atol=5e-2, rtol=5e-2)

    print("KERNEL_OK")
</pallas_src>

<mosaic_0001>
module attributes {stable_mosaic.version = 11 : i64} {
  func.func @metacritic_kernel(%arg0: i32, %arg1: memref<16x32xbf16, #tpu.memory_space<vmem>>, %arg2: memref<16x8xbf16, #tpu.memory_space<vmem>>, %arg3: memref<32x64xbf16, #tpu.memory_space<vmem>>, %arg4: memref<8x64xbf16, #tpu.memory_space<vmem>>, %arg5: memref<1x64xf32, #tpu.memory_space<vmem>>, %arg6: memref<64x128xbf16, #tpu.memory_space<vmem>>, %arg7: memref<1x128xf32, #tpu.memory_space<vmem>>, %arg8: memref<128x64xbf16, #tpu.memory_space<vmem>>, %arg9: memref<1x64xf32, #tpu.memory_space<vmem>>, %arg10: memref<64x32xbf16, #tpu.memory_space<vmem>>, %arg11: memref<1x32xf32, #tpu.memory_space<vmem>>, %arg12: memref<32x128xbf16, #tpu.memory_space<vmem>>, %arg13: memref<1x128xf32, #tpu.memory_space<vmem>>, %arg14: memref<16x128xbf16, #tpu.memory_space<vmem>>) attributes {dimension_semantics = [#tpu.dimension_semantics<parallel>], iteration_bounds = array<i64: 1>, scalar_prefetch = 0 : i64, scratch_operands = 0 : i64, tpu.core_type = #tpu.core_type<tc>, window_params = [{transform_indices = @transform_0, window_bounds = array<i64: 16, 32>}, {transform_indices = @transform_1, window_bounds = array<i64: 16, 8>}, {pipeline_mode = #tpu.pipeline_mode<synchronous>, transform_indices = @transform_2, window_bounds = array<i64: 32, 64>}, {pipeline_mode = #tpu.pipeline_mode<synchronous>, transform_indices = @transform_3, window_bounds = array<i64: 8, 64>}, {pipeline_mode = #tpu.pipeline_mode<synchronous>, transform_indices = @transform_4, window_bounds = array<i64: 1, 64>}, {pipeline_mode = #tpu.pipeline_mode<synchronous>, transform_indices = @transform_5, window_bounds = array<i64: 64, 128>}, {pipeline_mode = #tpu.pipeline_mode<synchronous>, transform_indices = @transform_6, window_bounds = array<i64: 1, 128>}, {pipeline_mode = #tpu.pipeline_mode<synchronous>, transform_indices = @transform_7, window_bounds = array<i64: 128, 64>}, {pipeline_mode = #tpu.pipeline_mode<synchronous>, transform_indices = @transform_8, window_bounds = array<i64: 1, 64>}, {pipeline_mode = #tpu.pipeline_mode<synchronous>, transform_indices = @transform_9, window_bounds = array<i64: 64, 32>}, {pipeline_mode = #tpu.pipeline_mode<synchronous>, transform_indices = @transform_10, window_bounds = array<i64: 1, 32>}, {pipeline_mode = #tpu.pipeline_mode<synchronous>, transform_indices = @transform_11, window_bounds = array<i64: 32, 128>}, {pipeline_mode = #tpu.pipeline_mode<synchronous>, transform_indices = @transform_12, window_bounds = array<i64: 1, 128>}, {transform_indices = @transform_13, window_bounds = array<i64: 16, 128>}]} {
    %c0 = arith.constant 0 : index
    %c0_0 = arith.constant 0 : index
    %0 = vector.load %arg1[%c0, %c0_0] : memref<16x32xbf16, #tpu.memory_space<vmem>>, vector<16x32xbf16>
    %c0_1 = arith.constant 0 : index
    %c0_2 = arith.constant 0 : index
    %1 = vector.load %arg3[%c0_1, %c0_2] : memref<32x64xbf16, #tpu.memory_space<vmem>>, vector<32x64xbf16>
    %cst = arith.constant dense<0.000000e+00> : vector<16x64xf32>
    %2 = tpu.matmul %0, %1, %cst {dimension_numbers = #tpu.dot_dimension_numbers<[1], [0], [0], [1], [0, 0, 1, 1], [], []>} : vector<16x32xbf16>, vector<32x64xbf16>, vector<16x64xf32> -> vector<16x64xf32>
    %c0_3 = arith.constant 0 : index
    %c0_4 = arith.constant 0 : index
    %3 = vector.load %arg2[%c0_3, %c0_4] : memref<16x8xbf16, #tpu.memory_space<vmem>>, vector<16x8xbf16>
    %c0_5 = arith.constant 0 : index
    %c0_6 = arith.constant 0 : index
    %4 = vector.load %arg4[%c0_5, %c0_6] : memref<8x64xbf16, #tpu.memory_space<vmem>>, vector<8x64xbf16>
    %cst_7 = arith.constant dense<0.000000e+00> : vector<16x64xf32>
    %5 = tpu.matmul %3, %4, %cst_7 {dimension_numbers = #tpu.dot_dimension_numbers<[1], [0], [0], [1], [0, 0, 1, 1], [], []>} : vector<16x8xbf16>, vector<8x64xbf16>, vector<16x64xf32> -> vector<16x64xf32>
    %6 = arith.addf %2, %5 : vector<16x64xf32>
    %c0_8 = arith.constant 0 : index
    %c0_9 = arith.constant 0 : index
    %7 = vector.load %arg5[%c0_8, %c0_9] : memref<1x64xf32, #tpu.memory_space<vmem>>, vector<1x64xf32>
    %8 = vector.broadcast %7 : vector<1x64xf32> to vector<16x64xf32>
    %9 = arith.addf %6, %8 : vector<16x64xf32>
    %cst_10 = arith.constant 0.000000e+00 : f32
    %10 = vector.broadcast %cst_10 : f32 to vector<16x64xf32>
    %11 = arith.maximumf %9, %10 : vector<16x64xf32>
    %12 = arith.truncf %11 : vector<16x64xf32> to vector<16x64xbf16>
    %c0_11 = arith.constant 0 : index
    %c0_12 = arith.constant 0 : index
    %13 = vector.load %arg6[%c0_11, %c0_12] : memref<64x128xbf16, #tpu.memory_space<vmem>>, vector<64x128xbf16>
    %cst_13 = arith.constant dense<0.000000e+00> : vector<16x128xf32>
    %14 = tpu.matmul %12, %13, %cst_13 {dimension_numbers = #tpu.dot_dimension_numbers<[1], [0], [0], [1], [0, 0, 1, 1], [], []>} : vector<16x64xbf16>, vector<64x128xbf16>, vector<16x128xf32> -> vector<16x128xf32>
    %c0_14 = arith.constant 0 : index
    %c0_15 = arith.constant 0 : index
    %15 = vector.load %arg7[%c0_14, %c0_15] : memref<1x128xf32, #tpu.memory_space<vmem>>, vector<1x128xf32>
    %16 = vector.broadcast %15 : vector<1x128xf32> to vector<16x128xf32>
    %17 = arith.addf %14, %16 : vector<16x128xf32>
    %18 = arith.truncf %17 : vector<16x128xf32> to vector<16x128xbf16>
    %c0_16 = arith.constant 0 : index
    %c0_17 = arith.constant 0 : index
    %19 = vector.load %arg8[%c0_16, %c0_17] : memref<128x64xbf16, #tpu.memory_space<vmem>>, vector<128x64xbf16>
    %cst_18 = arith.constant dense<0.000000e+00> : vector<16x64xf32>
    %20 = tpu.matmul %18, %19, %cst_18 {dimension_numbers = #tpu.dot_dimension_numbers<[1], [0], [0], [1], [0, 0, 1, 1], [], []>} : vector<16x128xbf16>, vector<128x64xbf16>, vector<16x64xf32> -> vector<16x64xf32>
    %c0_19 = arith.constant 0 : index
    %c0_20 = arith.constant 0 : index
    %21 = vector.load %arg9[%c0_19, %c0_20] : memref<1x64xf32, #tpu.memory_space<vmem>>, vector<1x64xf32>
    %22 = vector.broadcast %21 : vector<1x64xf32> to vector<16x64xf32>
    %23 = arith.addf %20, %22 : vector<16x64xf32>
    %cst_21 = arith.constant 0.000000e+00 : f32
    %24 = vector.broadcast %cst_21 : f32 to vector<16x64xf32>
    %25 = arith.maximumf %23, %24 : vector<16x64xf32>
    %26 = arith.truncf %25 : vector<16x64xf32> to vector<16x64xbf16>
    %c0_22 = arith.constant 0 : index
    %c0_23 = arith.constant 0 : index
    %27 = vector.load %arg10[%c0_22, %c0_23] : memref<64x32xbf16, #tpu.memory_space<vmem>>, vector<64x32xbf16>
    %cst_24 = arith.constant dense<0.000000e+00> : vector<16x32xf32>
    %28 = tpu.matmul %26, %27, %cst_24 {dimension_numbers = #tpu.dot_dimension_numbers<[1], [0], [0], [1], [0, 0, 1, 1], [], []>} : vector<16x64xbf16>, vector<64x32xbf16>, vector<16x32xf32> -> vector<16x32xf32>
    %c0_25 = arith.constant 0 : index
    %c0_26 = arith.constant 0 : index
    %29 = vector.load %arg11[%c0_25, %c0_26] : memref<1x32xf32, #tpu.memory_space<vmem>>, vector<1x32xf32>
    %30 = vector.broadcast %29 : vector<1x32xf32> to vector<16x32xf32>
    %31 = arith.addf %28, %30 : vector<16x32xf32>
    %cst_27 = arith.constant 0.000000e+00 : f32
    %32 = vector.broadcast %cst_27 : f32 to vector<16x32xf32>
    %33 = arith.maximumf %31, %32 : vector<16x32xf32>
    %34 = arith.truncf %33 : vector<16x32xf32> to vector<16x32xbf16>
    %c0_28 = arith.constant 0 : index
    %c0_29 = arith.constant 0 : index
    %35 = vector.load %arg12[%c0_28, %c0_29] : memref<32x128xbf16, #tpu.memory_space<vmem>>, vector<32x128xbf16>
    %cst_30 = arith.constant dense<0.000000e+00> : vector<16x128xf32>
    %36 = tpu.matmul %34, %35, %cst_30 {dimension_numbers = #tpu.dot_dimension_numbers<[1], [0], [0], [1], [0, 0, 1, 1], [], []>} : vector<16x32xbf16>, vector<32x128xbf16>, vector<16x128xf32> -> vector<16x128xf32>
    %c0_31 = arith.constant 0 : index
    %c0_32 = arith.constant 0 : index
    %37 = vector.load %arg13[%c0_31, %c0_32] : memref<1x128xf32, #tpu.memory_space<vmem>>, vector<1x128xf32>
    %38 = vector.broadcast %37 : vector<1x128xf32> to vector<16x128xf32>
    %39 = arith.addf %36, %38 : vector<16x128xf32>
    %40 = arith.addf %17, %39 : vector<16x128xf32>
    %41 = arith.truncf %40 : vector<16x128xf32> to vector<16x128xbf16>
    %c0_33 = arith.constant 0 : index
    %c0_34 = arith.constant 0 : index
    %42 = vector.load %arg14[%c0_33, %c0_34] : memref<16x128xbf16, #tpu.memory_space<vmem>>, vector<16x128xbf16>
    tpu.vector_store %arg14[%c0_33, %c0_34], %41 {strides = array<i32>} : memref<16x128xbf16, #tpu.memory_space<vmem>>, vector<16x128xbf16>,
    return
  }
  func.func @transform_0(%arg0: i32) -> (i32, i32) {
    %c0_i32 = arith.constant 0 : i32
    %c0_i32_0 = arith.constant 0 : i32
    return %arg0, %c0_i32 : i32, i32
  }
  func.func @transform_1(%arg0: i32) -> (i32, i32) {
    %c0_i32 = arith.constant 0 : i32
    %c0_i32_0 = arith.constant 0 : i32
    return %arg0, %c0_i32 : i32, i32
  }
  func.func @transform_2(%arg0: i32) -> (i32, i32) {
    %c0_i32 = arith.constant 0 : i32
    %c0_i32_0 = arith.constant 0 : i32
    %c0_i32_1 = arith.constant 0 : i32
    return %c0_i32, %c0_i32_0 : i32, i32
  }
  func.func @transform_3(%arg0: i32) -> (i32, i32) {
    %c0_i32 = arith.constant 0 : i32
    %c0_i32_0 = arith.constant 0 : i32
    %c0_i32_1 = arith.constant 0 : i32
    return %c0_i32, %c0_i32_0 : i32, i32
  }
  func.func @transform_4(%arg0: i32) -> (i32, i32) {
    %c0_i32 = arith.constant 0 : i32
    %c0_i32_0 = arith.constant 0 : i32
    %c0_i32_1 = arith.constant 0 : i32
    return %c0_i32, %c0_i32_0 : i32, i32
  }
  func.func @transform_5(%arg0: i32) -> (i32, i32) {
    %c0_i32 = arith.constant 0 : i32
    %c0_i32_0 = arith.constant 0 : i32
    %c0_i32_1 = arith.constant 0 : i32
    return %c0_i32, %c0_i32_0 : i32, i32
  }
  func.func @transform_6(%arg0: i32) -> (i32, i32) {
    %c0_i32 = arith.constant 0 : i32
    %c0_i32_0 = arith.constant 0 : i32
    %c0_i32_1 = arith.constant 0 : i32
    return %c0_i32, %c0_i32_0 : i32, i32
  }
  func.func @transform_7(%arg0: i32) -> (i32, i32) {
    %c0_i32 = arith.constant 0 : i32
    %c0_i32_0 = arith.constant 0 : i32
    %c0_i32_1 = arith.constant 0 : i32
    return %c0_i32, %c0_i32_0 : i32, i32
  }
  func.func @transform_8(%arg0: i32) -> (i32, i32) {
    %c0_i32 = arith.constant 0 : i32
    %c0_i32_0 = arith.constant 0 : i32
    %c0_i32_1 = arith.constant 0 : i32
    return %c0_i32, %c0_i32_0 : i32, i32
  }
  func.func @transform_9(%arg0: i32) -> (i32, i32) {
    %c0_i32 = arith.constant 0 : i32
    %c0_i32_0 = arith.constant 0 : i32
    %c0_i32_1 = arith.constant 0 : i32
    return %c0_i32, %c0_i32_0 : i32, i32
  }
  func.func @transform_10(%arg0: i32) -> (i32, i32) {
    %c0_i32 = arith.constant 0 : i32
    %c0_i32_0 = arith.constant 0 : i32
    %c0_i32_1 = arith.constant 0 : i32
    return %c0_i32, %c0_i32_0 : i32, i32
  }
  func.func @transform_11(%arg0: i32) -> (i32, i32) {
    %c0_i32 = arith.constant 0 : i32
    %c0_i32_0 = arith.constant 0 : i32
    %c0_i32_1 = arith.constant 0 : i32
    return %c0_i32, %c0_i32_0 : i32, i32
  }
  func.func @transform_12(%arg0: i32) -> (i32, i32) {
    %c0_i32 = arith.constant 0 : i32
    %c0_i32_0 = arith.constant 0 : i32
    %c0_i32_1 = arith.constant 0 : i32
    return %c0_i32, %c0_i32_0 : i32, i32
  }
  func.func @transform_13(%arg0: i32) -> (i32, i32) {
    %c0_i32 = arith.constant 0 : i32
    %c0_i32_0 = arith.constant 0 : i32
    return %arg0, %c0_i32 : i32, i32
  }
}

</mosaic_0001>

<bundles_post_ra>
// kernel: metacritic_forward.1
= control target key start
LH: loop header
LB: loop body
LE: loop exit
PB: predicated region body
PF: predicated region fallthrough
CT: control target
= control target key end

     0   :  { %vm63_vm0 = vcmask 1043456   ;;  %v709_v0 = vmov 0.0   ;;  %vm710_vm1 = vmmov 0   ;;  %vm59_vm2 = vcmask 64512   ;;  %s905_s2 = inlined_call_operand.vmem [shape: bf16[32,64], index: 2, kind: input, shape index: {}]   ;;  %s906_s3 = inlined_call_operand.vmem [shape: bf16[8,64], index: 3, kind: input, shape index: {}]   ;;  %s907_s1 = inlined_call_operand.vmem [shape: bf16[16,8], index: 1, kind: input, shape index: {}]   ;;  %s908_s0 = inlined_call_operand.vmem [shape: bf16[16,32], index: 0, kind: input, shape index: {}]   ;;  %s909_s5 = inlined_call_operand.vmem [shape: bf16[64,128], index: 5, kind: input, shape index: {}]   ;;  %s910_s7 = inlined_call_operand.vmem [shape: bf16[128,64], index: 7, kind: input, shape index: {}]   ;;  %s911_s4 = inlined_call_operand.vmem [shape: f32[1,64], index: 4, kind: input, shape index: {}]   ;;  %s912_s9 = inlined_call_operand.vmem [shape: bf16[64,32], index: 9, kind: input, shape index: {}]   ;;  %s913_s6 = inlined_call_operand.vmem [shape: f32[1,128], index: 6, kind: input, shape index: {}]   ;;  %s914_s8 = inlined_call_operand.vmem [shape: f32[1,64], index: 8, kind: input, shape index: {}]   ;;  %s915_s11 = inlined_call_operand.vmem [shape: bf16[32,128], index: 11, kind: input, shape index: {}]   ;;  %s916_s10 = inlined_call_operand.vmem [shape: f32[1,32], index: 10, kind: input, shape index: {}]   ;;  %s917_s12 = inlined_call_operand.vmem [shape: f32[1,128], index: 12, kind: input, shape index: {}]   ;;  %s918_s13 = inlined_call_operand.vmem [shape: bf16[16,128], index: 13, kind: output, shape index: {}]  }
   0x1   :  { %625 = vmatprep.subr.bf16.mxu1 %v709_v0  ;;  %619 = vmatprep.subr.bf16.mxu0 %v709_v0  ;;  %v687_v1 = vld [vmem:[%s905_s2] sm:$0xff]   ;;  %v689_v5 = vld [vmem:[%s905_s2 + $0x8] sm:$0xff]   ;;  %vm125_vm3 = vcmask 261120   ;;  %v693_v9 = vld [vmem:[%s909_s5 + $0x10] sm:$0xff]   ;;  %vm221_vm4 = vcmask 523264  }
   0x2   :  { %v53_v2 = vld [vmem:[%s906_s3] sm:$0xf]  ;;  %621 = vmatprep.mubr.msk.bf16.mxu0 %vm710_vm1, %v709_v0  ;;  %629 = vmatprep.mubr.msk.bf16.mxu1 %vm710_vm1, %v709_v0  ;;  %v692_v8 = vld [vmem:[%s909_s5 + $0x8] sm:$0xff]   ;;  %v694_v10 = vld [vmem:[%s909_s5 + $0x18] sm:$0xff]  }
   0x3   :  { %626 = vmatpush3.bf16.msra.mxu1 %v687_v1  ;;  %v65_v3 = vsel %vm63_vm0, %v53_v2, 0  ;;  %v688_v4 = vld [vmem:[%s907_s1] sm:$0xff]   ;;  %v696_v12 = vld [vmem:[%s910_s7 + $0x8] sm:$0xff]   ;;  %v697_v13 = vld [vmem:[%s910_s7 + $0x10] sm:$0xff]  }
   0x4   :  { %620 = vmatpush3.bf16.msra.mxu0 %v65_v3  ;;  %627 = vmatprep.subr.bf16.mxu1 %v709_v0  ;;  %v690_v6 = vld [vmem:[%s908_s0] sm:$0xff]   ;;  %v698_v14 = vld [vmem:[%s910_s7 + $0x18] sm:$0xff]   ;;  %v700_v16 = vld [vmem:[%s910_s7 + $0x28] sm:$0xff]  }
   0x5   :  { %633 = vmatprep.subr.bf16.mxu0 %v709_v0  ;;  %v691_v7 = vld [vmem:[%s909_s5] sm:$0xff]   ;;  %v701_v33 = vld [vmem:[%s910_s7 + $0x30] sm:$0xff]   ;;  %v702_v34 = vld [vmem:[%s910_s7 + $0x38] sm:$0xff]  }
   0x6   :  { %v695_v11 = vld [vmem:[%s910_s7] sm:$0xff]   ;;  %v704_v36 = vld [vmem:[%s912_s9 + $0x8] sm:$0xff]   ;;  %v705_v45 = vld [vmem:[%s912_s9 + $0x10] sm:$0xff]  }
   0x7   :  { %622 = vmatmul.mubr.msk.bf16.vlgmr.msra.gmra.mrb[0].mxu0 %vm59_vm2, %v688_v4  ;;  %628 = vmatpush3.bf16.msra.mxu1 %v689_v5  ;;  %v699_v15 = vld [vmem:[%s910_s7 + $0x20] sm:$0xff]   ;;  %v706_v46 = vld [vmem:[%s912_s9 + $0x18] sm:$0xff]   ;;  %v708_v58 = vld [vmem:[%s915_s11 + $0x8] sm:$0xff]  }
   0x8   :  { %634 = vmatpush3.bf16.msra.mxu0 %v691_v7  ;;  %641 = vmatprep.mubr.msk.bf16.mxu0 %vm710_vm1, %v709_v0  ;;  %v557_v22 = vld [vmem:[%s911_s4] ss:$0 sm:$0xff] }
   0x9   :  { %635 = vmatprep.subr.bf16.mxu0 %v709_v0  ;;  %645 = vmatprep.subr.bf16.mxu1 %v709_v0  ;;  %v703_v35 = vld [vmem:[%s912_s9] sm:$0xff]  }
   0xa   :  { %630 = vmatmul.mubr.msk.bf16.vlgmr.msra.gmra.mrb[0].mxu1 %vm125_vm3, %v690_v6  ;;  %v558_v37 = vld [vmem:[%s913_s6] ss:$0 sm:$0xff] }
   0xb   :  { %661 = vmatprep.mubr.msk.bf16.mxu1 %vm710_vm1, %v709_v0  ;;  %646 = vmatpush3.bf16.msra.mxu1 %v695_v11  ;;  %v564_v47 = vld [vmem:[%s914_s8] ss:$0 sm:$0xff] }
   0xc   :  { %636 = vmatpush3.bf16.msra.mxu0 %v692_v8  ;;  %647 = vmatprep.subr.bf16.mxu1 %v709_v0  ;;  %v707_v57 = vld [vmem:[%s915_s11] sm:$0xff]  }
   0xd   :  { %637 = vmatprep.subr.bf16.mxu0 %v709_v0  ;;  %v573_v59 = vld [vmem:[%s916_s10] ss:$0 sm:$0xff] }
   0xf   :  { %648 = vmatpush3.bf16.msra.mxu1 %v696_v12 }
  0x10   :  { %638 = vmatpush3.bf16.msra.mxu0 %v693_v9  ;;  %649 = vmatprep.subr.bf16.mxu1 %v709_v0 }
  0x11   :  { %639 = vmatprep.subr.bf16.mxu0 %v709_v0 }
  0x13   :  { %650 = vmatpush3.bf16.msra.mxu1 %v697_v13 }
  0x14   :  { %640 = vmatpush3.bf16.msra.mxu0 %v694_v10  ;;  %651 = vmatprep.subr.bf16.mxu1 %v709_v0 }
  0x15   :  { %665 = vmatprep.subr.bf16.mxu0 %v709_v0 }
  0x17   :  { %652 = vmatpush3.bf16.msra.mxu1 %v698_v14 }
  0x18   :  { %653 = vmatprep.subr.bf16.mxu1 %v709_v0 }
  0x1b   :  { %654 = vmatpush3.bf16.msra.mxu1 %v699_v15 }
  0x1c   :  { %655 = vmatprep.subr.bf16.mxu1 %v709_v0 }
  0x1f   :  { %656 = vmatpush3.bf16.msra.mxu1 %v700_v16 }
  0x20   :  { %657 = vmatprep.subr.bf16.mxu1 %v709_v0 }
  0x23   :  { %658 = vmatpush3.bf16.msra.mxu1 %v701_v33 }
  0x24   :  { %659 = vmatprep.subr.bf16.mxu1 %v709_v0 }
  0x27   :  { %660 = vmatpush3.bf16.msra.mxu1 %v702_v34 }
  0xda   :  { %v101_v17 = vpop.f32.mrb[0].mxu0 }
  0xdb   :  { %v623_v18 = vpop.f32.mrb[1].mxu0 }
  0xdc   :  { %v104_v19 = vpop.f32.mrb[2].mxu0 }
  0xdd   :  { %v624_v20 = vpop.f32.mrb[3].mxu0  ;;  %v163_v21 = vpop.f32.mrb[0].mxu1 }
  0xde   :  { %v164_v23 = vadd.f32 %v163_v21, %v101_v17  ;;  %v631_v24 = vpop.f32.mrb[1].mxu1 }
  0xdf   :  { %v166_v25 = vpop.f32.mrb[2].mxu1 }
  0xe0   :  { %v177_v26 = vadd.f32 %v557_v22, %v164_v23  ;;  %v167_v27 = vadd.f32 %v166_v25, %v104_v19  ;;  %v632_v28 = vpop.f32.mrb[3].mxu1 }
  0xe2   :  { %v178_v29 = vadd.f32 %v557_v22, %v167_v27  ;;  %v179_v30 = vmax.f32 %v177_v26, 0.0 }
  0xe4   :  { %v180_v31 = vmax.f32 %v178_v29, 0.0 }
  0xe6   :  { %v181_v32 = vpack.c.bf16 %v180_v31, %v179_v30 }
  0xe8   :  { %642 = vmatmul.mubr.msk.bf16.vlgmr.msra.gmra.mrb[4].mxu0 %vm221_vm4, %v181_v32 }
  0xe9   :  { %673 = vmatprep.mubr.msk.bf16.mxu0 %vm710_vm1, %v709_v0  ;;  %666 = vmatpush3.bf16.msra.mxu0 %v703_v35 }
  0xea   :  { %667 = vmatprep.subr.bf16.mxu0 %v709_v0 }
  0xed   :  { %668 = vmatpush3.bf16.msra.mxu0 %v704_v36 }
  0xee   :  { %669 = vmatprep.subr.bf16.mxu0 %v709_v0 }
  0xf1   :  { %670 = vmatpush3.bf16.msra.mxu0 %v705_v45 }
  0xf2   :  { %671 = vmatprep.subr.bf16.mxu0 %v709_v0 }
  0xf5   :  { %672 = vmatpush3.bf16.msra.mxu0 %v706_v46 }
  0xf6   :  { %677 = vmatprep.subr.bf16.mxu0 %v709_v0 }
 0x1bb   :  { %v259_v38 = vpop.f32.mrb[4].mxu0 }
 0x1bc   :  { %v643_v39 = vpop.f32.mrb[5].mxu0  ;;  %v260_v41 = vadd.f32 %v558_v37, %v259_v38 }
 0x1bd   :  { %v262_v40 = vpop.f32.mrb[6].mxu0 }
 0x1be   :  { %v263_v42 = vadd.f32 %v558_v37, %v262_v40  ;;  %v644_v43 = vpop.f32.mrb[7].mxu0 }
 0x1c0   :  { %v266_v44 = vpack.c.bf16 %v263_v42, %v260_v41 }
 0x1c2   :  { %662 = vmatmul.mubr.bf16.vlgmr.msra.gmra.mrb[4].mxu1 %v266_v44 }
 0x295   :  { %v372_v48 = vpop.f32.mrb[4].mxu1 }
 0x296   :  { %v373_v49 = vadd.f32 %v564_v47, %v372_v48  ;;  %v663_v50 = vpop.f32.mrb[5].mxu1 }
 0x297   :  { %v375_v51 = vpop.f32.mrb[6].mxu1 }
 0x298   :  { %v376_v52 = vadd.f32 %v564_v47, %v375_v51  ;;  %v664_v53 = vpop.f32.mrb[7].mxu1  ;;  %v379_v54 = vmax.f32 %v373_v49, 0.0 }
 0x29a   :  { %v380_v55 = vmax.f32 %v376_v52, 0.0 }
 0x29c   :  { %v381_v56 = vpack.c.bf16 %v380_v55, %v379_v54 }
 0x29e   :  { %674 = vmatmul.mubr.msk.bf16.vlgmr.msra.gmra.mrb[8].mxu0 %vm221_vm4, %v381_v56 }
 0x29f   :  { %681 = vmatprep.mubr.msk.bf16.mxu0 %vm710_vm1, %v709_v0  ;;  %678 = vmatpush3.bf16.msra.mxu0 %v707_v57 }
 0x2a0   :  { %679 = vmatprep.subr.bf16.mxu0 %v709_v0  ;;  %v579_v0 = vld [vmem:[%s917_s12] ss:$0 sm:$0xff] }
 0x2a3   :  { %680 = vmatpush3.bf16.msra.mxu0 %v708_v58 }
 0x371   :  { %v458_v60 = vpop.f32.mrb[8].mxu0 }
 0x372   :  { %v459_v61 = vadd.f32 %v573_v59, %v458_v60  ;;  %v675_v62 = vpop.f32.mrb[9].mxu0 }
 0x373   :  { %v461_v63 = vpop.f32.mrb[10].mxu0 }
 0x374   :  { %v462_v1 = vadd.f32 %v573_v59, %v461_v63  ;;  %v676_v2 = vpop.f32.mrb[11].mxu0  ;;  %v465_v3 = vmax.f32 %v459_v61, 0.0 }
 0x376   :  { %v466_v4 = vmax.f32 %v462_v1, 0.0 }
 0x378   :  { %v467_v5 = vpack.c.bf16 %v466_v4, %v465_v3 }
 0x37a   :  { %682 = vmatmul.mubr.msk.bf16.vlgmr.msra.gmra.mrb[12].mxu0 %vm125_vm3, %v467_v5 }
 0x44d   :  { %v528_v6 = vpop.f32.mrb[12].mxu0 }
 0x44e   :  { %v529_v7 = vadd.f32 %v579_v0, %v528_v6  ;;  %v683_v8 = vpop.f32.mrb[13].mxu0 }
 0x44f   :  { %v531_v9 = vpop.f32.mrb[14].mxu0 }
 0x450   :  { %v532_v10 = vadd.f32 %v579_v0, %v531_v9  ;;  %v684_v11 = vpop.f32.mrb[15].mxu0  ;;  %v535_v12 = vadd.f32 %v529_v7, %v260_v41 }
 0x452   :  { %v536_v13 = vadd.f32 %v532_v10, %v263_v42 }
 0x454   :  { %v590_v14 = vpack.c.bf16 %v536_v13, %v535_v12 }
 0x456   :  { %591 = vst [vmem:[%s918_s13] sm:$0xff] %v590_v14  }

</bundles_post_ra>
